<compile_context>
chip_gen: v7x
topology: tpu7x:2x2x1
jax: 0.10.0
libtpu: 0.0.40
codegen_flags: <defaults>
</compile_context>

<pallas_src>
import functools

import numpy as np

import jax
import jax.numpy as jnp
from jax import lax
from jax.experimental import pallas as pl
from jax.experimental.pallas import tpu as pltpu

BN_EPS = 1e-5


# --------------------------------------------------------------- roll probe --

@functools.cache
def _roll_matches_np() -> bool:
    """Probe pltpu.roll's direction convention once (cheap, cached).

    Guarantees the shifted-tap construction is correct regardless of whether
    roll moves elements toward higher indices (np.roll) or lower indices.
    """
    def k(x_ref, o_ref):
        o_ref[...] = pltpu.roll(x_ref[...], 1, 1)

    x = jnp.arange(8 * 128, dtype=jnp.float32).reshape(8, 128)
    out = pl.pallas_call(
        k,
        out_shape=jax.ShapeDtypeStruct((8, 128), jnp.float32),
        grid=(1,),
        in_specs=[pl.BlockSpec((8, 128), lambda i: (0, 0))],
        out_specs=pl.BlockSpec((8, 128), lambda i: (0, 0)),
    )(x)
    # np.roll semantics: result[0, 1] == x[0, 0]
    return bool(out[0, 1] == x[0, 0])


# ------------------------------------------------------------- fused kernel --

def _conv_block_kernel(x_ref, w1_ref, b1_ref, g1_ref, be1_ref,
                       w2_ref, b2_ref, g2_ref, be2_ref,
                       mask_ref, sel_ref, o_ref, *, K, W, M, roll_sign):
    """Fused conv->BN->ReLU->conv->BN->ReLU->maxpool, all VMEM-resident.

    Layout: activations are (C on sublanes, M = N*H*W on lanes).
      x_ref   : (Cin, M)
      wX_ref  : (K*K, Cout, Cin_conv)   tap-major weights
      bX/gX/beX : (Cout, 1)
      mask_ref: (K*K, 1, M)  1.0 where the shifted tap is spatially valid
      sel_ref : (M, Mp)      0/1 selection matrix performing the 2x2 decimation
      o_ref   : (Cout, Mp)
    """
    half = K // 2
    shifts = [dh * W + dw
              for dh in range(-half, half + 1)
              for dw in range(-half, half + 1)]

    def shifted(act, s):
        # returns value v with v[:, p] = act[:, (p + s) mod M]
        if s % M == 0:
            return act
        return pltpu.roll(act, (roll_sign * -s) % M, 1)

    def conv_same(act, w_ref, b_ref):
        acc = None
        for t, s in enumerate(shifts):
            tap = shifted(act, s) * mask_ref[t]            # (Cin, M)
            d = jnp.dot(w_ref[t], tap,                     # (Cout, Cin)@(Cin, M)
                        preferred_element_type=jnp.float32)
            acc = d if acc is None else acc + d
        return acc + b_ref[...]                            # (Cout, M)

    def bn_relu(y, g_ref, be_ref):
        # training-mode batch stats over N*H*W (lane axis), per channel
        mean = jnp.mean(y, axis=1, keepdims=True)
        var = jnp.mean(jnp.square(y - mean), axis=1, keepdims=True)
        z = (y - mean) * lax.rsqrt(var + BN_EPS) * g_ref[...] + be_ref[...]
        return jnp.maximum(z, 0.0)

    x = x_ref[...]
    a1 = bn_relu(conv_same(x, w1_ref, b1_ref), g1_ref, be1_ref)     # (Cout, M)
    a2 = bn_relu(conv_same(a1, w2_ref, b2_ref), g2_ref, be2_ref)    # (Cout, M)

    # 2x2/2 max-pool: taps at offsets {0, 1, W, W+1}; decimation via MXU matmul
    # with a 0/1 selection matrix -> lane-dense (Cout, Mp) output.
    m01 = jnp.maximum(a2, shifted(a2, 1))
    m4 = jnp.maximum(m01, shifted(m01, W))
    o_ref[...] = jnp.dot(m4, sel_ref[...], preferred_element_type=jnp.float32)


def conv_block_pallas(x_cm, w1m, b1, g1, be1, w2m, b2, g2, be2, mask, sel,
                      *, K, W, M, Mp, Cout, roll_sign):
    kernel = functools.partial(_conv_block_kernel,
                               K=K, W=W, M=M, roll_sign=roll_sign)

    def full(shape):
        return pl.BlockSpec(shape, lambda i, _n=len(shape): (0,) * _n)

    args = (x_cm, w1m, b1, g1, be1, w2m, b2, g2, be2, mask, sel)
    return pl.pallas_call(
        kernel,
        out_shape=jax.ShapeDtypeStruct((Cout, Mp), jnp.float32),
        grid=(1,),
        in_specs=[full(a.shape) for a in args],
        out_specs=full((Cout, Mp)),
        compiler_params=pltpu.CompilerParams(
            dimension_semantics=("arbitrary",)),
    )(*args)


# ------------------------------------------------------------------ wrapper --

@functools.partial(jax.jit, static_argnames=("kernels", "strides", "paddings"))
def conv_block_forward(x_nchw, params, kernels, strides, paddings):
    N, Cin, H, W = x_nchw.shape
    Cout = params["w1"].shape[0]
    K1, K2 = kernels

    # Fused kernel covers the module's stride-1 'same' configuration.
    # TODO(synk): general strides / non-'same' paddings would need an im2col
    # fallback path; not exercised by this module instantiation.
    assert K1 == K2 and K1 % 2 == 1, (K1, K2)
    assert strides == (1, 1), strides
    assert paddings == (K1 // 2, K2 // 2), paddings
    assert H % 2 == 0 and W % 2 == 0, (H, W)

    K = K1
    half = K // 2
    M = N * H * W
    Ho, Wo = H // 2, W // 2
    Mp = N * Ho * Wo

    # Host-side constants (folded by XLA): tap validity masks + pool selection.
    p = np.arange(M)
    hh, ww = (p // W) % H, p % W
    mask = np.stack([
        (((hh + dh) >= 0) & ((hh + dh) < H) &
         ((ww + dw) >= 0) & ((ww + dw) < W))
        for dh in range(-half, half + 1)
        for dw in range(-half, half + 1)
    ]).astype(np.float32).reshape(K * K, 1, M)

    q = np.arange(Mp)
    n_, r_ = q // (Ho * Wo), q % (Ho * Wo)
    base = n_ * H * W + (r_ // Wo) * 2 * W + (r_ % Wo) * 2
    sel = np.zeros((M, Mp), np.float32)
    sel[base, q] = 1.0

    def wmat(w):   # OIHW -> (K*K, Cout, Cin), tap order (dh major, dw minor)
        co, ci = w.shape[0], w.shape[1]
        return jnp.transpose(w, (2, 3, 0, 1)).reshape(K * K, co, ci)

    def col(v):
        return v.reshape(-1, 1).astype(jnp.float32)

    # (N, C, H, W) -> (C, N*H*W): channel on sublanes, flattened spatial on lanes
    x_cm = jnp.transpose(x_nchw, (1, 0, 2, 3)).reshape(Cin, M).astype(jnp.float32)

    out_cm = conv_block_pallas(
        x_cm,
        wmat(params["w1"]), col(params["b1"]), col(params["g1"]), col(params["be1"]),
        wmat(params["w2"]), col(params["b2"]), col(params["g2"]), col(params["be2"]),
        jnp.asarray(mask), jnp.asarray(sel),
        K=K, W=W, M=M, Mp=Mp, Cout=Cout,
        roll_sign=1 if _roll_matches_np() else -1)

    # (Cout, N*Ho*Wo) -> NCHW
    return jnp.transpose(out_cm.reshape(Cout, N, Ho, Wo), (1, 0, 2, 3))


# --------------------------------------------------------- pure-JAX reference

def ref_forward(x, params, kernels, strides, paddings):
    def conv(x, w, b, s, p):
        y = lax.conv_general_dilated(
            x, w, (s, s), [(p, p), (p, p)],
            dimension_numbers=("NCHW", "OIHW", "NCHW"))
        return y + b.reshape(1, -1, 1, 1)

    def bnr(y, g, be):
        mean = jnp.mean(y, axis=(0, 2, 3), keepdims=True)
        var = jnp.mean(jnp.square(y - mean), axis=(0, 2, 3), keepdims=True)
        z = ((y - mean) * lax.rsqrt(var + BN_EPS)
             * g.reshape(1, -1, 1, 1) + be.reshape(1, -1, 1, 1))
        return jnp.maximum(z, 0.0)

    y = bnr(conv(x, params["w1"], params["b1"], strides[0], paddings[0]),
            params["g1"], params["be1"])
    y = bnr(conv(y, params["w2"], params["b2"], strides[1], paddings[1]),
            params["g2"], params["be2"])
    return lax.reduce_window(y, -jnp.inf, lax.max,
                             (1, 1, 2, 2), (1, 1, 2, 2), "VALID")


# --------------------------------------------------------------------- main --

if __name__ == "__main__":
    # ConvBlock(in_out_shapes=(4, 8), kernels=(3, 3), strides=(1, 1), paddings=(1, 1))
    Cin, Cout = 4, 8
    kernels, strides, paddings = (3, 3), (1, 1), (1, 1)
    N, H, W = 2, 16, 16

    key = jax.random.PRNGKey(0)
    k = jax.random.split(key, 7)
    params = {
        "w1": 0.1 * jax.random.normal(k[0], (Cout, Cin, kernels[0], kernels[0]), jnp.float32),
        "b1": 0.01 * jax.random.normal(k[1], (Cout,), jnp.float32),
        "g1": 1.0 + 0.1 * jax.random.normal(k[2], (Cout,), jnp.float32),
        "be1": 0.1 * jax.random.normal(k[3], (Cout,), jnp.float32),
        "w2": 0.1 * jax.random.normal(k[4], (Cout, Cout, kernels[1], kernels[1]), jnp.float32),
        "b2": 0.01 * jax.random.normal(k[5], (Cout,), jnp.float32),
        "g2": jnp.ones((Cout,), jnp.float32),
        "be2": jnp.zeros((Cout,), jnp.float32),
    }
    x = jax.random.normal(k[6], (N, Cin, H, W), jnp.float32)

    _roll_matches_np()   # run the tiny direction probe once, outside jit tracing

    out = conv_block_forward(x, params, kernels, strides, paddings)
    out = jax.block_until_ready(out)

    ref = jax.block_until_ready(ref_forward(x, params, kernels, strides, paddings))
    assert out.shape == (N, Cout, H // 2, W // 2), out.shape
    assert jnp.allclose(out, ref, atol=1e-2, rtol=1e-2), float(
        jnp.max(jnp.abs(out - ref)))

    print("KERNEL_OK")
</pallas_src>

<mosaic_0001>
module attributes {stable_mosaic.version = 11 : i64} {
  func.func @k(%arg0: i32, %arg1: memref<8x128xf32, #tpu.memory_space<vmem>>, %arg2: memref<8x128xf32, #tpu.memory_space<vmem>>) attributes {dimension_semantics = [#tpu.dimension_semantics<arbitrary>], iteration_bounds = array<i64: 1>, scalar_prefetch = 0 : i64, scratch_operands = 0 : i64, tpu.core_type = #tpu.core_type<tc>, window_params = [{pipeline_mode = #tpu.pipeline_mode<synchronous>, transform_indices = @transform_0, window_bounds = array<i64: 8, 128>}, {pipeline_mode = #tpu.pipeline_mode<synchronous>, transform_indices = @transform_1, window_bounds = array<i64: 8, 128>}]} {
    %c0 = arith.constant 0 : index
    %c0_0 = arith.constant 0 : index
    %0 = vector.load %arg1[%c0, %c0_0] : memref<8x128xf32, #tpu.memory_space<vmem>>, vector<8x128xf32>
    %c1_i32 = arith.constant 1 : i32
    %1 = tpu.dynamic_rotate %0 by %c1_i32 dim 1 : vector<8x128xf32>, i32 -> vector<8x128xf32>
    %c0_1 = arith.constant 0 : index
    %c0_2 = arith.constant 0 : index
    %2 = vector.load %arg2[%c0_1, %c0_2] : memref<8x128xf32, #tpu.memory_space<vmem>>, vector<8x128xf32>
    tpu.vector_store %arg2[%c0_1, %c0_2], %1 {strides = array<i32>} : memref<8x128xf32, #tpu.memory_space<vmem>>, vector<8x128xf32>,
    return
  }
  func.func @transform_0(%arg0: i32) -> (i32, i32) {
    %c0_i32 = arith.constant 0 : i32
    %c0_i32_0 = arith.constant 0 : i32
    %c0_i32_1 = arith.constant 0 : i32
    return %c0_i32, %c0_i32_0 : i32, i32
  }
  func.func @transform_1(%arg0: i32) -> (i32, i32) {
    %c0_i32 = arith.constant 0 : i32
    %c0_i32_0 = arith.constant 0 : i32
    %c0_i32_1 = arith.constant 0 : i32
    return %c0_i32, %c0_i32_0 : i32, i32
  }
}

</mosaic_0001>

<bundles_post_ra>
// kernel: tpu_custom_call.1
= control target key start
LH: loop header
LB: loop body
LE: loop exit
PB: predicated region body
PF: predicated region fallthrough
CT: control target
= control target key end

     0   :  { %6 = vsyncpa [#allocation3], 0  ;;  %s128_s0 = inlined_call_operand.hbm [shape: f32[8,128], index: 0, kind: input, shape index: {}]   ;;  %s129_s1 = inlined_call_operand.hbm [shape: f32[8,128], index: 1, kind: output, shape index: {}]  }
   0x1   :  { %7 = vsyncpa [#allocation4], 0  ;;  %s91_s6 = smov [#allocation2]   ;;  %s43_s10 = scalar_lea.hbm %s128_s0, 128 }
   0x2   :  { %s14_s7 = sshll.u32 %s91_s6, 4  ;;  %p44_p0 = scmp.ne.s32.totalorder %s128_s0, %s43_s10  ;;  %s15_s7 = int_to_ptr.vmem [resolvable:$true] %s14_s7 }
   0x3   :  { %p47_p1 = scmp.lt.u32.totalorder %s43_s10, %s128_s0 }
   0x5   :  { %p49_p2 = pnand %p47_p1, %p44_p0 }
   0x7   :  { %52 = shalt.err (!%p49_p2)
}
   0x8   :  { %s53_s15 = scalar_lea.vmem %s15_s7, 128  ;;  %p58_p4 = scmp.lt.s32.totalorder %s15_s7, %s15_s7 }
   0x9   :  { %p54_p3 = scmp.ne.s32.totalorder %s15_s7, %s53_s15  ;;  %p59_p5 = scmp.lt.s32.totalorder %s53_s15, %s53_s15 }
   0xb   :  { %p60_p6 = por %p59_p5, %p58_p4 }
   0xd   :  { %p61_p7 = pnand %p60_p6, %p54_p3 }
   0xf   :  { %64 = shalt.err (!%p61_p7)
}
  0x10   :  { %17 = dma.hbm_to_vmem [thread:$0]  %s128_s0, 128, %s15_s7, [#allocation3]  }
  0x11   :  { %87 = dma.done.wait [#allocation3], 128  }
  0x12   :  { %88 = vsyncadd [#allocation3], 4294967168  ;;  %v21_v0 = vld [vmem:[#allocation2] sm:$0xff]  ;;  %s92_s18 = smov 1   ;;  %s93_s19 = smov [#allocation5]  }
  0x13   :  { %22 = vrot.lane.b32.xlu0 %v21_v0, %s92_s18  ;;  %s31_s20 = sshll.u32 %s93_s19, 4  ;;  %s32_s20 = int_to_ptr.vmem [resolvable:$true] %s31_s20 }
  0x14   :  { %s65_s21 = scalar_lea.vmem %s32_s20, 128  ;;  %p70_p9 = scmp.lt.s32.totalorder %s32_s20, %s32_s20 }
  0x15   :  { %p66_p8 = scmp.ne.s32.totalorder %s32_s20, %s65_s21  ;;  %p71_p10 = scmp.lt.s32.totalorder %s65_s21, %s65_s21 }
  0x17   :  { %p72_p11 = por %p71_p10, %p70_p9 }
  0x19   :  { %p73_p12 = pnand %p72_p11, %p66_p8 }
  0x85   :  { %v23_v1 = vpop.permute.xlu0 %22 }
  0x86   :  { %24 = vst [vmem:[#allocation5] sm:$0xff] %v23_v1 }
  0x87   :  { %76 = shalt.err (!%p73_p12)
}
  0x88   :  { %s77_s0 = scalar_lea.hbm %s129_s1, 128 }
  0x89   :  { %p78_p13 = scmp.ne.s32.totalorder %s129_s1, %s77_s0  ;;  %p81_p0 = scmp.lt.u32.totalorder %s77_s0, %s129_s1 }
  0x8b   :  { %p83_p1 = pnand %p81_p0, %p78_p13 }
  0x8d   :  { %86 = shalt.err (!%p83_p1)
}
  0x8e   :  { %34 = dma.vmem_to_hbm [thread:$0]  %s32_s20, 128, %s129_s1, [#allocation4]  }
  0x8f   :  { %89 = dma.done.wait [#allocation4], 128  }
  0x90   :  { %90 = vsyncadd [#allocation4], 4294967168 }
  0x91   :  { %38 = vsyncpa [#allocation3], 1 }
  0x92   :  { %39 = vsyncpa [#allocation4], 1 }

</bundles_post_ra>
